<compile_context>
chip_gen: v7x
topology: tpu7x:2x2x1
jax: 0.10.0
libtpu: 0.0.40
codegen_flags: <defaults>
</compile_context>

<pallas_src>
import jax
import jax.numpy as jnp
from jax.experimental import pallas as pl
from jax.experimental.pallas import tpu as pltpu


def _potential_ctrl_kernel(x_ref, t_ref, w1xT_ref, w1t_ref, b1_ref, w2_ref, gw_ref,
                           out_ref):
    # Feature-major tile: batch on lanes, features/hidden on sublanes.
    #   x_ref    : (D, tb)   input coordinates
    #   t_ref    : (1, tb)   time (row vector)
    #   w1xT_ref : (H, D)    W1[:D, :]^T         (forward:  h = W1x^T @ x + ...)
    #   w1t_ref  : (H, 1)    W1[D, :] as column  (t contribution, rank-1 broadcast)
    #   b1_ref   : (H, 1)
    #   w2_ref   : (H, 1)
    #   gw_ref   : (D, H)    sigma * W1[:D, :]   (backward: grad_x^T = gw @ g)
    x = x_ref[...]                                                          # (D, tb)
    h = jnp.dot(w1xT_ref[...], x, preferred_element_type=jnp.float32)       # (H, tb)
    h = h + w1t_ref[...] * t_ref[...] + b1_ref[...]                         # broadcasts
    a = jnp.tanh(h)                                                         # (H, tb)
    # analytic gradient w.r.t. x (b2 drops out):  dphi/dh = (1 - tanh(h)^2) * w2
    g = (1.0 - a * a) * w2_ref[...]                                         # (H, tb)
    # sde.diff(t, x) * dphi/dx  (sigma already folded into gw)
    out_ref[...] = jnp.dot(gw_ref[...], g,
                           preferred_element_type=jnp.float32).astype(out_ref.dtype)


def _choose_block_b(batch: int, block_b: int) -> int:
    bb = min(block_b, batch)
    if bb < batch and bb % 128 != 0:
        bb = max(128, (bb // 128) * 128)
    if bb >= batch:
        bb = batch
    return bb


def potential_ctrl_forward_fm(t_row, x_fm, w1, b1, w2, b2, sigma, *,
                              block_b=1024, out_dtype=jnp.float32):
    """Feature-major (lane-dense) core.

    t_row: (1, B) f32, x_fm: (D, B) f32 -> (D, B) out_dtype.
    """
    del b2  # constant offset of the potential; does not affect grad_x
    D, B = x_fm.shape
    Din, H = w1.shape
    assert Din == D + 1

    w1 = w1.astype(jnp.float32)
    w1x = w1[:D, :]                                        # (D, H)
    w1xT = jnp.transpose(w1x)                              # (H, D)  forward weight
    w1t_col = w1[D, :].reshape(H, 1)                       # (H, 1)  t-column of W1
    b1_col = b1.reshape(H, 1).astype(jnp.float32)
    w2_col = w2.reshape(H, 1).astype(jnp.float32)
    gw = (jnp.float32(sigma) * w1x)                        # (D, H)  sigma folded in

    bb = _choose_block_b(B, block_b)
    grid = (pl.cdiv(B, bb),)

    return pl.pallas_call(
        _potential_ctrl_kernel,
        out_shape=jax.ShapeDtypeStruct((D, B), out_dtype),
        grid_spec=pltpu.PrefetchScalarGridSpec(
            num_scalar_prefetch=0,
            grid=grid,
            in_specs=[
                pl.BlockSpec((D, bb), lambda i: (0, i)),   # x tile (batch on lanes)
                pl.BlockSpec((1, bb), lambda i: (0, i)),   # t tile
                pl.BlockSpec((H, D), lambda i: (0, 0)),    # W1x^T   (loop-invariant)
                pl.BlockSpec((H, 1), lambda i: (0, 0)),    # W1[D,:] (loop-invariant)
                pl.BlockSpec((H, 1), lambda i: (0, 0)),    # b1      (loop-invariant)
                pl.BlockSpec((H, 1), lambda i: (0, 0)),    # w2      (loop-invariant)
                pl.BlockSpec((D, H), lambda i: (0, 0)),    # sigma*W1x (loop-invariant)
            ],
            out_specs=pl.BlockSpec((D, bb), lambda i: (0, i)),   # lane-dense store
        ),
        compiler_params=pltpu.CompilerParams(dimension_semantics=("parallel",)),
    )(x_fm, t_row, w1xT, w1t_col, b1_col, w2_col, gw)


def potential_ctrl_forward(t, x, w1, b1, w2, b2, sigma, *,
                           block_b=1024, out_dtype=jnp.float32):
    """Batch-major convenience wrapper matching the PyTorch module interface.

    t: (B,1) f32, x: (B,D) f32 -> (B,D).
    The two transposes below are extra XLA HBM passes; callers that can keep
    feature-major data should call potential_ctrl_forward_fm directly.
    """
    x_fm = jnp.transpose(x).astype(jnp.float32)            # (D, B)
    t_row = jnp.transpose(t).astype(jnp.float32)           # (1, B)
    out_fm = potential_ctrl_forward_fm(t_row, x_fm, w1, b1, w2, b2, sigma,
                                       block_b=block_b, out_dtype=out_dtype)
    return jnp.transpose(out_fm)                            # (B, D)


def _phi_ref(t, x, w1, b1, w2, b2):
    z = jnp.concatenate([x, t], axis=-1)
    h = jnp.tanh(z @ w1 + b1.reshape(1, -1))
    return (h @ w2.reshape(-1, 1) + b2)[:, 0]


if __name__ == "__main__":
    B, D, H = 256, 4, 32
    sigma = 2.0  # OU diffusion coefficient (constant)
    # TODO(synk): clip_and_log norm clipping omitted (clip_model=None default -> identity).

    key = jax.random.PRNGKey(0)
    k_t, k_x, k_w1, k_b1, k_w2, k_b2 = jax.random.split(key, 6)

    t = jax.random.uniform(k_t, (B, 1), dtype=jnp.float32)
    x = jax.random.normal(k_x, (B, D), dtype=jnp.float32)

    # deterministic parameter init (potential MLP: (D+1) -> H -> 1)
    w1 = jax.random.normal(k_w1, (D + 1, H), dtype=jnp.float32) * 0.3
    b1 = jax.random.normal(k_b1, (H,), dtype=jnp.float32) * 0.1
    w2 = jax.random.normal(k_w2, (H,), dtype=jnp.float32) * 0.3
    b2 = jax.random.normal(k_b2, (1,), dtype=jnp.float32) * 0.1

    # block_b=128 -> grid of 2 steps at B=256 (keeps both v7x TensorCores busy);
    # for large B leave the default block_b=1024 (and sweep).
    out = potential_ctrl_forward(t, x, w1, b1, w2, b2, sigma, block_b=128)
    out = jax.block_until_ready(out)

    # pure-JAX reference: sigma * autograd-gradient of the potential w.r.t. x
    grad_fn = jax.grad(lambda xx: jnp.sum(_phi_ref(t, xx, w1, b1, w2, b2)))
    ref = sigma * grad_fn(x)

    assert out.shape == (B, D) and out.dtype == jnp.float32
    assert jnp.allclose(out, ref, atol=1e-5, rtol=1e-5), (out, ref)

    # also exercise the feature-major core directly (no wrapper transposes)
    out_fm = potential_ctrl_forward_fm(jnp.transpose(t), jnp.transpose(x),
                                       w1, b1, w2, b2, sigma, block_b=128)
    out_fm = jax.block_until_ready(out_fm)
    assert jnp.allclose(jnp.transpose(out_fm), ref, atol=1e-5, rtol=1e-5)

    print("KERNEL_OK")
</pallas_src>

<mosaic_0001>
module attributes {stable_mosaic.version = 11 : i64} {
  func.func @_potential_ctrl_kernel(%arg0: i32, %arg1: memref<4x128xf32, #tpu.memory_space<vmem>>, %arg2: memref<1x128xf32, #tpu.memory_space<vmem>>, %arg3: memref<32x4xf32, #tpu.memory_space<vmem>>, %arg4: memref<32x1xf32, #tpu.memory_space<vmem>>, %arg5: memref<32x1xf32, #tpu.memory_space<vmem>>, %arg6: memref<32x1xf32, #tpu.memory_space<vmem>>, %arg7: memref<4x32xf32, #tpu.memory_space<vmem>>, %arg8: memref<4x128xf32, #tpu.memory_space<vmem>>) attributes {dimension_semantics = [#tpu.dimension_semantics<parallel>], iteration_bounds = array<i64: 2>, scalar_prefetch = 0 : i64, scratch_operands = 0 : i64, tpu.core_type = #tpu.core_type<tc>, window_params = [{transform_indices = @transform_0, window_bounds = array<i64: 4, 128>}, {transform_indices = @transform_1, window_bounds = array<i64: 1, 128>}, {pipeline_mode = #tpu.pipeline_mode<synchronous>, transform_indices = @transform_2, window_bounds = array<i64: 32, 4>}, {pipeline_mode = #tpu.pipeline_mode<synchronous>, transform_indices = @transform_3, window_bounds = array<i64: 32, 1>}, {pipeline_mode = #tpu.pipeline_mode<synchronous>, transform_indices = @transform_4, window_bounds = array<i64: 32, 1>}, {pipeline_mode = #tpu.pipeline_mode<synchronous>, transform_indices = @transform_5, window_bounds = array<i64: 32, 1>}, {pipeline_mode = #tpu.pipeline_mode<synchronous>, transform_indices = @transform_6, window_bounds = array<i64: 4, 32>}, {transform_indices = @transform_7, window_bounds = array<i64: 4, 128>}]} {
    %c0 = arith.constant 0 : index
    %c0_0 = arith.constant 0 : index
    %0 = vector.load %arg1[%c0, %c0_0] : memref<4x128xf32, #tpu.memory_space<vmem>>, vector<4x128xf32>
    %c0_1 = arith.constant 0 : index
    %c0_2 = arith.constant 0 : index
    %1 = vector.load %arg3[%c0_1, %c0_2] : memref<32x4xf32, #tpu.memory_space<vmem>>, vector<32x4xf32>
    %cst = arith.constant dense<0.000000e+00> : vector<32x128xf32>
    %2 = tpu.matmul %1, %0, %cst {dimension_numbers = #tpu.dot_dimension_numbers<[1], [0], [0], [1], [0, 0, 1, 1], [], []>} : vector<32x4xf32>, vector<4x128xf32>, vector<32x128xf32> -> vector<32x128xf32>
    %c0_3 = arith.constant 0 : index
    %c0_4 = arith.constant 0 : index
    %3 = vector.load %arg4[%c0_3, %c0_4] : memref<32x1xf32, #tpu.memory_space<vmem>>, vector<32x1xf32>
    %c0_5 = arith.constant 0 : index
    %c0_6 = arith.constant 0 : index
    %4 = vector.load %arg2[%c0_5, %c0_6] : memref<1x128xf32, #tpu.memory_space<vmem>>, vector<1x128xf32>
    %5 = vector.broadcast %3 : vector<32x1xf32> to vector<32x128xf32>
    %6 = vector.broadcast %4 : vector<1x128xf32> to vector<32x128xf32>
    %7 = arith.mulf %5, %6 : vector<32x128xf32>
    %8 = arith.addf %2, %7 : vector<32x128xf32>
    %c0_7 = arith.constant 0 : index
    %c0_8 = arith.constant 0 : index
    %9 = vector.load %arg5[%c0_7, %c0_8] : memref<32x1xf32, #tpu.memory_space<vmem>>, vector<32x1xf32>
    %10 = vector.broadcast %9 : vector<32x1xf32> to vector<32x128xf32>
    %11 = arith.addf %8, %10 : vector<32x128xf32>
    %12 = math.tanh %11 : vector<32x128xf32>
    %13 = arith.mulf %12, %12 : vector<32x128xf32>
    %cst_9 = arith.constant 1.000000e+00 : f32
    %14 = vector.broadcast %cst_9 : f32 to vector<32x128xf32>
    %15 = arith.subf %14, %13 : vector<32x128xf32>
    %c0_10 = arith.constant 0 : index
    %c0_11 = arith.constant 0 : index
    %16 = vector.load %arg6[%c0_10, %c0_11] : memref<32x1xf32, #tpu.memory_space<vmem>>, vector<32x1xf32>
    %17 = vector.broadcast %16 : vector<32x1xf32> to vector<32x128xf32>
    %18 = arith.mulf %15, %17 : vector<32x128xf32>
    %c0_12 = arith.constant 0 : index
    %c0_13 = arith.constant 0 : index
    %19 = vector.load %arg7[%c0_12, %c0_13] : memref<4x32xf32, #tpu.memory_space<vmem>>, vector<4x32xf32>
    %cst_14 = arith.constant dense<0.000000e+00> : vector<4x128xf32>
    %20 = tpu.matmul %19, %18, %cst_14 {dimension_numbers = #tpu.dot_dimension_numbers<[1], [0], [0], [1], [0, 0, 1, 1], [], []>} : vector<4x32xf32>, vector<32x128xf32>, vector<4x128xf32> -> vector<4x128xf32>
    %c0_15 = arith.constant 0 : index
    %c0_16 = arith.constant 0 : index
    %21 = vector.load %arg8[%c0_15, %c0_16] : memref<4x128xf32, #tpu.memory_space<vmem>>, vector<4x128xf32>
    tpu.vector_store %arg8[%c0_15, %c0_16], %20 {strides = array<i32>} : memref<4x128xf32, #tpu.memory_space<vmem>>, vector<4x128xf32>,
    return
  }
  func.func @transform_0(%arg0: i32) -> (i32, i32) {
    %c0_i32 = arith.constant 0 : i32
    %c0_i32_0 = arith.constant 0 : i32
    return %c0_i32, %arg0 : i32, i32
  }
  func.func @transform_1(%arg0: i32) -> (i32, i32) {
    %c0_i32 = arith.constant 0 : i32
    %c0_i32_0 = arith.constant 0 : i32
    return %c0_i32, %arg0 : i32, i32
  }
  func.func @transform_2(%arg0: i32) -> (i32, i32) {
    %c0_i32 = arith.constant 0 : i32
    %c0_i32_0 = arith.constant 0 : i32
    %c0_i32_1 = arith.constant 0 : i32
    return %c0_i32, %c0_i32_0 : i32, i32
  }
  func.func @transform_3(%arg0: i32) -> (i32, i32) {
    %c0_i32 = arith.constant 0 : i32
    %c0_i32_0 = arith.constant 0 : i32
    %c0_i32_1 = arith.constant 0 : i32
    return %c0_i32, %c0_i32_0 : i32, i32
  }
  func.func @transform_4(%arg0: i32) -> (i32, i32) {
    %c0_i32 = arith.constant 0 : i32
    %c0_i32_0 = arith.constant 0 : i32
    %c0_i32_1 = arith.constant 0 : i32
    return %c0_i32, %c0_i32_0 : i32, i32
  }
  func.func @transform_5(%arg0: i32) -> (i32, i32) {
    %c0_i32 = arith.constant 0 : i32
    %c0_i32_0 = arith.constant 0 : i32
    %c0_i32_1 = arith.constant 0 : i32
    return %c0_i32, %c0_i32_0 : i32, i32
  }
  func.func @transform_6(%arg0: i32) -> (i32, i32) {
    %c0_i32 = arith.constant 0 : i32
    %c0_i32_0 = arith.constant 0 : i32
    %c0_i32_1 = arith.constant 0 : i32
    return %c0_i32, %c0_i32_0 : i32, i32
  }
  func.func @transform_7(%arg0: i32) -> (i32, i32) {
    %c0_i32 = arith.constant 0 : i32
    %c0_i32_0 = arith.constant 0 : i32
    return %c0_i32, %arg0 : i32, i32
  }
}

</mosaic_0001>

<bundles_post_ra>
// kernel: tpu_custom_call.1
= control target key start
LH: loop header
LB: loop body
LE: loop exit
PB: predicated region body
PF: predicated region fallthrough
CT: control target
= control target key end

     0   :  { %12 = vsyncpa [#allocation3], 0  ;;  %s1032_s0 = inlined_call_operand.vmem [shape: f32[4,256], index: 0, kind: input, shape index: {}]   ;;  %s1033_s1 = inlined_call_operand.vmem [shape: f32[1,256], index: 1, kind: input, shape index: {}]   ;;  %s1034_s2 = inlined_call_operand.vmem [shape: f32[32,4], index: 2, kind: input, shape index: {}]   ;;  %s1035_s3 = inlined_call_operand.vmem [shape: f32[32,1], index: 3, kind: input, shape index: {}]   ;;  %s1036_s4 = inlined_call_operand.vmem [shape: f32[32,1], index: 4, kind: input, shape index: {}]   ;;  %s1037_s5 = inlined_call_operand.vmem [shape: f32[32,1], index: 5, kind: input, shape index: {}]   ;;  %s1038_s6 = inlined_call_operand.vmem [shape: f32[4,32], index: 6, kind: input, shape index: {}]   ;;  %s1039_s7 = inlined_call_operand.hbm [shape: f32[4,256], index: 7, kind: output, shape index: {}]  }
   0x1   :  { %14 = vsyncpa [#allocation3 + $0x1], 0  ;;  %s870_s24 = smov 0   ;;  %s872_s25 = smov 0  }
   0x2   :  { %s874_s26 = smov 0   ;;  %s876_s27 = smov 0  }
   0x3 LB: > { %s891_s28 = sadd.s32 4294967295, %s823_s27   ;;  %s656_s29 = sadd.s32 4294967294, %s823_s27   ;;  %s823_s27 = sphi %s876_s27, %s1045_s27   ;;  %s819_s26 = sphi %s874_s26, %s1044_s26   ;;  %s815_s25 = sphi %s872_s25, %s1043_s25   ;;  %s811_s24 = sphi %s870_s24, %s1042_s24  }
   0x4   : > { %s895_s30 = sadd.s32 1, %s823_s27   ;;  %s184_s8 = sadd.s32 1, %s819_s26 }
   0x5   : > { %s181_s9 = ssub.s32 %s823_s27, %s895_s30  ;;  %p194_p0 = scmp.ne.s32.totalorder %s819_s26, %s815_s25 }
   0x6   : > { %p182_p1 = scmp.eq.s32.totalorder %s181_s9, 0  ;;  %p195_p2 = scmp.eq.s32.totalorder %s891_s28, 1 }
   0x7   : > { %p200_p3 = scmp.ne.s32.totalorder %s815_s25, %s811_s24  ;;  %p201_p4 = scmp.eq.s32.totalorder %s656_s29, 1 }
   0x8   : > { %s906_s10 = scalar_select %p182_p1, %s819_s26, %s184_s8  }
   0x9   : > { %p908_p5 = por %p195_p2, %p194_p0  ;;  %p912_p6 = por %p201_p4, %p200_p3 }
   0xa   : > { %p659_p7 = scmp.ge.s32.totalorder %s823_s27, 1  ;;  %p247_p8 = scmp.lt.s32.totalorder %s823_s27, 3 }
   0xc   : > { %p248_p9 = pnand %p659_p7, %p247_p8 }
   0xd   : > { %p281_p10 = scmp.lt.s32.totalorder (!%p248_p9), %s891_s28, 1  ;;  %v289_v0 = vld [vmem:[%s1034_s2] sm:$0xff] (!%p248_p9)  ;;  %vm328_vm0 = vcmask (!%p248_p9), 31744   ;;  %v295_v1 = vld [vmem:[%s1035_s3 + $0x10] sm:$0xff] (!%p248_p9)  ;;  %v825_v3 = vmov (!%p248_p9), 0   ;;  %vm341_vm1 = vcmask (!%p248_p9), 1043456  }
   0xe   : > { %251 = sbr.rel (%p248_p9) target bundleno = 497 (0x1f1), region = 48  ;;  %685 = vmatprep.mubr.msk.f32.mxu0 (!%p248_p9), %vm328_vm0, %v289_v0  ;;  %v293_v2 = vld [vmem:[%s1035_s3] sm:$0xff] (!%p248_p9)  ;;  %752 = vset.pattern.permute.xlu1 (!%p248_p9), %v825_v3  ;;  %v296_v4 = vld [vmem:[%s1035_s3 + $0x18] sm:$0xff] (!%p248_p9)  ;;  %v294_v5 = vld [vmem:[%s1035_s3 + $0x8] sm:$0xff] (!%p248_p9)  ;;  %v826_v18 = vmov (!%p248_p9), 0.0|0.0   ;;  %vm827_vm2 = vmmov (!%p248_p9), 0  }
   0xf   : > { %751 = vset.pattern.permute.xlu0 (!%p248_p9), %v825_v3  ;;  %310 = vperm.xlu1 (!%p248_p9), %752, %v295_v1   ;;  %v290_v7 = vld [vmem:[%s1034_s2 + $0x8] sm:$0xff] (!%p248_p9)  ;;  %v291_v8 = vld [vmem:[%s1034_s2 + $0x10] sm:$0xff] (!%p248_p9)  ;;  %v430_v10 = vld [vmem:[%s1036_s4] sm:$0xff] (!%p248_p9)  ;;  %v828_v19 = vmov (!%p248_p9), 0.0   ;;  %vm499_vm3 = vcmask (!%p248_p9), 261120   ;;  %s278_s14 = sand.u32 (!%p248_p9), 1, %s815_s25  }
  0x10   : > { %300 = vperm.xlu0 (!%p248_p9), %751, %v293_v2   ;;  %v431_v9 = vld [vmem:[%s1036_s4 + $0x8] sm:$0xff] (!%p248_p9)  ;;  %v292_v11 = vld [vmem:[%s1034_s2 + $0x18] sm:$0xff] (!%p248_p9)  ;;  %v432_v13 = vld [vmem:[%s1036_s4 + $0x10] sm:$0xff] (!%p248_p9)  ;;  %702 = vmatprep.subr.bf16.mxu1 (!%p248_p9), %v826_v18  ;;  %s660_s15 = sshll.u32 (!%p248_p9), %s278_s14, 2  ;;  %s670_s18 = sshll.u32 (!%p248_p9), %s891_s28, 6 }
  0x11   : > { %v433_v12 = vld [vmem:[%s1036_s4 + $0x18] sm:$0xff] (!%p248_p9)  ;;  %v471_v14 = vld [vmem:[%s1037_s5 + $0x8] sm:$0xff] (!%p248_p9)  ;;  %v470_v15 = vld [vmem:[%s1037_s5] sm:$0xff] (!%p248_p9)  ;;  %699 = vmatprep.mubr.msk.f32.mxu1 (!%p248_p9), %vm827_vm2, %v828_v19  ;;  %s280_s16 = scalar_lea.vmem (!%p248_p9), [#allocation2], %s660_s15  ;;  %s992_s22 = scalar_lea.hbm (!%p248_p9), %s1039_s7, %s670_s18 }
  0x12   : > { %v473_v16 = vld [vmem:[%s1037_s5 + $0x18] sm:$0xff] (!%p248_p9)  ;;  %v472_v17 = vld [vmem:[%s1037_s5 + $0x10] sm:$0xff] (!%p248_p9)  ;;  %v498_v3 = vld [vmem:[%s1038_s6] sm:$0xf] (!%p248_p9)  ;;  %s588_s17 = sshll.u32 (!%p248_p9), %s280_s16, 4  ;;  %s575_s23 = scalar_lea.sflag (!%p248_p9), [#allocation3], %s278_s14  ;;  %s987_s17 = int_to_ptr.vmem [resolvable:$true] %s588_s17 }
  0x13   : > { %315 = vperm.xlu1 (!%p248_p9), %752, %v296_v4   ;;  %s761_s29 = scalar_lea.vmem (!%p248_p9), %s987_s17, 64 }
  0x14   : > { %305 = vperm.xlu0 (!%p248_p9), %751, %v294_v5   ;;  %p762_p11 = scmp.ne.s32.totalorder (!%p248_p9), %s987_s17, %s761_s29 }
  0x15   : > { %s930_s19 = scalar_select %p281_p10, %s891_s28, 1 }
  0x16   : > { %p763_p12 = pnand %p762_p11, %p908_p5  ;;  %s829_s28 = smov [#allocation2]  }
  0x17   : > { %s661_s20 = sshll.u32 %s930_s19, 2  ;;  %441 = vperm.xlu1 %752, %v431_v9   ;;  %s287_s9 = scalar_lea.vmem %s1033_s1, %s930_s19 }
  0x18   : > { %s284_s8 = scalar_lea.vmem %s1032_s0, %s661_s20  ;;  %436 = vperm.xlu0 %751, %v430_v10   ;;  %v662_v24 = vld [vmem:[%s287_s9] ss:$0 sm:$0xff]  ;;  %p764_p13 = pneg %p763_p12 }
  0x19   : > { %v288_v6 = vld [vmem:[%s284_s8] sm:$0xf]  ;;  %s765_s8 = sshll.u32 %s829_s28, 4  ;;  %s766_s8 = int_to_ptr.vmem [resolvable:$false] %s765_s8 }
  0x1a   : > { %683 = vmatprep.subr.msk.mxu0 %vm341_vm1, %v288_v6  ;;  %s767_s9 = scalar_lea.vmem %s766_s8, 128  ;;  %p768_p0 = scmp.lt.s32.totalorder %s987_s17, %s766_s8 }
  0x1b   : > { %684 = vmatpush3.msk.msra.mxu0 %vm341_vm1, %v288_v6  ;;  %451 = vperm.xlu1 %752, %v433_v12   ;;  %p769_p1 = scmp.lt.s32.totalorder %s767_s9, %s761_s29 }
  0x1c   : > { %686 = vmatmul.mubr.msk.f32.vlgmr.msra.gmra.mrb[0].mxu0 %vm328_vm0, %v290_v7  ;;  %446 = vperm.xlu0 %751, %v432_v13  }
  0x1d   : > { %688 = vmatprep.mubr.msk.f32.mxu0 %vm328_vm0, %v291_v8  ;;  %p770_p2 = por %p769_p1, %p768_p0 }
  0x1f   : > { %481 = vperm.xlu1 %752, %v471_v14   ;;  %p771_p3 = pnand %p770_p2, %p764_p13 }
  0x20   : > { %689 = vmatmul.mubr.msk.f32.gmra.mrb[2].mxu0 %vm328_vm0, %v292_v11  ;;  %476 = vperm.xlu0 %751, %v470_v15  }
  0x23   : > { %491 = vperm.xlu1 %752, %v473_v16  }
  0x24   : > { %486 = vperm.xlu0 %751, %v472_v17  }
  0x8e   : > { %v311_v20 = vpop.permute.xlu1 %310 }
  0x8f   : > { %v301_v21 = vpop.permute.xlu0 %300  ;;  %v326_v35 = vmul.f32 %v662_v24, %v311_v20 }
  0x90   : > { %v324_v26 = vmul.f32 %v662_v24, %v301_v21 }
  0x92   : > { %v316_v22 = vpop.permute.xlu1 %315 }
  0x93   : > { %v306_v23 = vpop.permute.xlu0 %305  ;;  %v327_v33 = vmul.f32 %v662_v24, %v316_v22 }
  0x94   : > { %v325_v25 = vmul.f32 %v662_v24, %v306_v23 }
  0x96   : > { %v442_v27 = vpop.permute.xlu1 %441 }
  0x97   : > { %v437_v29 = vpop.permute.xlu0 %436 }
  0x9a   : > { %v452_v40 = vpop.permute.xlu1 %451 }
  0x9b   : > { %v447_v42 = vpop.permute.xlu0 %446 }
  0x9e   : > { %v482_v48 = vpop.permute.xlu1 %481 }
  0x9f   : > { %v477_v50 = vpop.permute.xlu0 %476 }
  0xa2   : > { %v492_v60 = vpop.permute.xlu1 %491 }
  0xa3   : > { %v487_v63 = vpop.permute.xlu0 %486 }
  0xef   : > { %v687_v28 = vpop.f32.mrb[0].mxu0 }
  0xf0   : > { %v417_v30 = vadd.f32 %v687_v28, %v325_v25  ;;  %v411_v31 = vpop.f32.mrb[1].mxu0 }
  0xf1   : > { %v412_v32 = vadd.f32 %v411_v31, %v324_v26 }
  0xf2   : > { %v455_v34 = vadd.f32 %v442_v27, %v417_v30 }
  0xf3   : > { %v454_v36 = vadd.f32 %v437_v29, %v412_v32  ;;  %v690_v37 = vpop.f32.mrb[2].mxu0 }
  0xf4   : > { %753 = vtanh.f32 %v455_v34  ;;  %v427_v38 = vadd.f32 %v690_v37, %v327_v33  ;;  %v421_v39 = vpop.f32.mrb[3].mxu0 }
  0xf5   : > { %755 = vtanh.f32 %v454_v36  ;;  %v422_v41 = vadd.f32 %v421_v39, %v326_v35 }
  0xf6   : > { %v457_v43 = vadd.f32 %v452_v40, %v427_v38 }
  0xf7   : > { %v456_v44 = vadd.f32 %v447_v42, %v422_v41 }
  0xf8   : > { %757 = vtanh.f32 %v457_v43 }
  0xf9   : > { %759 = vtanh.f32 %v456_v44 }
  0xfe   : > { %v754_v45 = vpop.eup %753 }
  0xff   : > { %v756_v46 = vpop.eup %755  ;;  %v463_v47 = vmul.f32 %v754_v45, %v754_v45 }
 0x100   : > { %v462_v49 = vmul.f32 %v756_v46, %v756_v46 }
 0x101   : > { %v467_v51 = vsub.f32 1.0, %v463_v47 }
 0x102   : > { %v758_v52 = vpop.eup %757  ;;  %v466_v53 = vsub.f32 1.0, %v462_v49 }
 0x103   : > { %v760_v54 = vpop.eup %759  ;;  %v465_v55 = vmul.f32 %v758_v52, %v758_v52  ;;  %v495_v56 = vmul.f32 %v482_v48, %v467_v51 }
 0x104   : > { %v464_v57 = vmul.f32 %v760_v54, %v760_v54  ;;  %v494_v58 = vmul.f32 %v477_v50, %v466_v53 }
 0x105   : > { %v469_v59 = vsub.f32 1.0, %v465_v55 }
 0x106   : > { %v468_v61 = vsub.f32 1.0, %v464_v57  ;;  %v703_v62 = vpack.c.bf16 %v495_v56, %v494_v58 }
 0x107   : > { %v497_v0 = vmul.f32 %v492_v60, %v469_v59 }
 0x108   : > { %704 = vmatpush3.bf16.msra.mxu1 %v703_v62  ;;  %v496_v1 = vmul.f32 %v487_v63, %v468_v61 }
 0x109   : > { %705 = vmatprep.subr.bf16.mxu1 %v826_v18 }
 0x10a   : > { %v706_v2 = vpack.c.bf16 %v497_v0, %v496_v1 }
 0x10c   : > { %707 = vmatpush3.bf16.msra.mxu1 %v706_v2 }
 0x10f   : > { %700 = vmatmul.mubr.msk.f32.vlgmr.msra.gmra.mrb[0].mxu1 %vm499_vm3, %v498_v3 }
 0x1e2   : > { %v569_v4 = vpop.f32.mrb[0].mxu1 }
 0x1e3   : > { %573 = vst [vmem:[%s280_s16] sm:$0xf] %v569_v4  ;;  %v701_v5 = vpop.f32.mrb[1].mxu1 }
 0x1e4   : > { %774 = shalt.err (!%p771_p3)
}
 0x1e5   : > { %s775_s19 = scalar_lea.hbm %s992_s22, 64  ;;  %s779_s15 = scalar_lea.hbm %s1039_s7, 128 }
 0x1e6   : > { %p776_p4 = scmp.ne.s32.totalorder %s992_s22, %s775_s19  ;;  %p780_p9 = scmp.lt.u32.totalorder %s992_s22, %s1039_s7 }
 0x1e7   : > { %p781_p10 = scmp.lt.u32.totalorder %s779_s15, %s775_s19  ;;  %p783_p12 = scmp.lt.u32.totalorder %s775_s19, %s992_s22 }
 0x1e8   : > { %p777_p7 = pnand %p776_p4, %p908_p5 }
 0x1e9   : > { %p782_p11 = por %p781_p10, %p780_p9 }
 0x1ea   : > { %p778_p8 = pneg %p777_p7 }
 0x1eb   : > { %p784_p13 = por %p783_p12, %p782_p11 }
 0x1ed   : > { %p785_p0 = pnand %p784_p13, %p778_p8 }
 0x1ef   : > { %788 = shalt.err (!%p785_p0)
}
 0x1f0   : > { %708 = dma.vmem_to_hbm [thread:$0]  (%p908_p5), %s987_s17, 64, %s992_s22, %s575_s23  }
 0x1f1 PF: > { %p714_p1 = scmp.ge.s32.totalorder %s823_s27, 2  ;;  %s600_s21 = sand.u32 1, %s811_s24  }
 0x1f2   : > { %s601_s20 = scalar_lea.sflag [#allocation3], %s600_s21 }
 0x1f3   : > { %p711_p2 = pnand %p714_p1, %p912_p6 }
 0x1f5   : > { %806 = dma.done.wait (!%p711_p2), %s601_s20, 64  }
 0x1f6   : > { %808 = vsyncadd (!%p711_p2), %s601_s20, 4294967232  ;;  %p17_p3 = scmp.ge.s32.totalorder %s895_s30, 4   ;;  %s1042_s24 = smov %s815_s25 }
 0x1f7   : > { %s1043_s25 = smov %s819_s26  ;;  %s1044_s26 = smov %s906_s10 }
 0x1f8   : > { %s1045_s27 = smov %s895_s30  ;;  %19 = sbr.rel (!%p17_p3) target bundleno = 3 (0x3), region = 86 }
 0x1ff   :  { %606 = vsyncpa [#allocation3], 1 }
 0x200   :  { %608 = vsyncpa [#allocation3 + $0x1], 1 }

</bundles_post_ra>
